<compile_context>
chip_gen: v6e
topology: v6e:2x2x1
jax: 0.10.0
libtpu: 0.0.40
codegen_flags: <defaults>
</compile_context>

<pallas_src>
from math import ceil, sqrt

import jax
import jax.numpy as jnp
import numpy as np
from jax import lax
from jax.experimental import pallas as pl
from jax.experimental.pallas import tpu as pltpu


def _conv2x_kernel(x_ref, w1_ref, b1_ref, w2_ref, b2_ref, o_ref):
    """Fused conv3x3(pad=1) -> conv3x3(pad=1) -> ReLU for Nb batch elements.

    x_ref : (Nb, H, W*Cin)          bf16, un-padded input, (w, cin) on lanes
    w1_ref: (3*W*Cin, W*Cmid)       bf16 ky-stacked banded weights
    b1_ref: (1, W*Cmid)             f32 bias tiled along W
    w2_ref: (3*W*Cmid, W*Cout)      bf16 ky-stacked banded weights
    b2_ref: (1, W*Cout)             f32 bias tiled along W
    o_ref : (Nb, H, W*Cout)         lane-dense output (128 lanes at test size)
    """
    Nb, H, WCin = x_ref.shape
    WCmid = w1_ref.shape[1]
    WCout = o_ref.shape[2]
    M = Nb * H

    x = x_ref[...]                                             # (Nb, H, WCin)

    # ---- conv1: im2row over ky (H padding=1 = zero rows, per batch element),
    #      then a single MXU dot with K = 3*W*Cin.  f32 accumulation. ----------
    z1 = jnp.zeros((Nb, 1, WCin), x.dtype)
    lhs1 = jnp.concatenate(
        [
            jnp.concatenate([z1, x[:, :H - 1]], axis=1),       # tap ky=0: row h-1
            x,                                                 # tap ky=1: row h
            jnp.concatenate([x[:, 1:], z1], axis=1),           # tap ky=2: row h+1
        ],
        axis=-1,
    ).reshape(M, 3 * WCin)

    acc1 = jnp.dot(lhs1, w1_ref[...], preferred_element_type=jnp.float32)
    acc1 = acc1 + b1_ref[...]                                  # f32 bias

    # bf16 rounding point for the mid activation (MXU operand for conv2).
    mid = acc1.astype(w2_ref.dtype).reshape(Nb, H, WCmid)

    # ---- conv2: same im2row-over-ky construction, single dot K = 3*W*Cmid ----
    z2 = jnp.zeros((Nb, 1, WCmid), mid.dtype)
    lhs2 = jnp.concatenate(
        [
            jnp.concatenate([z2, mid[:, :H - 1]], axis=1),
            mid,
            jnp.concatenate([mid[:, 1:], z2], axis=1),
        ],
        axis=-1,
    ).reshape(M, 3 * WCmid)

    acc2 = jnp.dot(lhs2, w2_ref[...], preferred_element_type=jnp.float32)
    acc2 = acc2 + b2_ref[...]

    # Dropout2d == identity in eval mode, then ReLU (f32 epilogue).
    o_ref[...] = jnp.maximum(acc2, 0.0).reshape(Nb, H, WCout).astype(o_ref.dtype)


def _stacked_banded_weights(w_oihw, W, dtype):
    """OIHW (Cout, Cin, 3, 3) -> (3*W*Cin, W*Cout) im2row-stacked banded matrix.

    Row index ky*(W*Cin) + wp*Cin + ci pairs with the kernel's im2row lane order
    (tap ky | source column wp | channel ci); column index is w*Cout + co.
    The zero band over (wp, w) encodes the W-direction padding=1; stacking ky
    along rows folds the 3 vertical taps into the contraction dimension K.
    NOTE: O(W^2) bytes / MXU work -- switch to a W-tiled block-banded scheme for
    large W (see module docstring, item 7).
    """
    Cout, Cin, KH, KW = w_oihw.shape
    w_k = jnp.transpose(w_oihw, (2, 3, 1, 0)).astype(jnp.float32)  # (ky,kx,ci,co)
    sel = np.zeros((KW, W, W), np.float32)                         # sel[kx,wp,w]
    for kx in range(KW):
        for w in range(W):
            wp = w + kx - 1
            if 0 <= wp < W:
                sel[kx, wp, w] = 1.0
    band = jnp.einsum("xpw,yxio->ypiwo", jnp.asarray(sel), w_k)    # (ky,wp,ci,w,co)
    return band.reshape(KH * W * Cin, W * Cout).astype(dtype)


def prepare_params(w1_oihw, b1, w2_oihw, b2, W, compute_dtype=jnp.bfloat16):
    """One-time parameter preparation (hoisted out of the per-call path)."""
    Cmid = w1_oihw.shape[0]
    Cin = w1_oihw.shape[1]
    Cout = w2_oihw.shape[0]
    w1s = _stacked_banded_weights(w1_oihw, W, compute_dtype)   # (3*W*Cin,  W*Cmid)
    w2s = _stacked_banded_weights(w2_oihw, W, compute_dtype)   # (3*W*Cmid, W*Cout)
    b1t = jnp.tile(b1.astype(jnp.float32), W).reshape(1, W * Cmid)
    b2t = jnp.tile(b2.astype(jnp.float32), W).reshape(1, W * Cout)
    return (w1s, b1t, w2s, b2t)


def _pick_block_batch(N, H, target_rows):
    """Largest Nb dividing N with Nb*H <= target_rows, keeping >= 2 grid steps
    whenever N >= 2 (so both v7x TensorCores have work)."""
    best = 1
    for nb in range(1, N + 1):
        if N % nb != 0:
            continue
        if N >= 2 and (N // nb) < 2:
            continue
        if nb * H <= target_rows:
            best = nb
    return best


def keep_size_conv2d_x2s(x_nchw, params, *, out_dtype=jnp.float32,
                         compute_dtype=jnp.bfloat16, target_rows=256):
    """Forward pass of KeepSizeConv2dLayerx2S.

    x_nchw: (N, Cin, H, W) f32.  `params` comes from prepare_params().
    target_rows: MXU M per grid step (~256 for v6e/v7x, ~128 for v5e).
    """
    w1s, b1t, w2s, b2t = params
    N, Cin, H, W = x_nchw.shape
    WCin = W * Cin
    WCmid = w1s.shape[1]
    WCout = w2s.shape[1]
    Cout = WCout // W

    Nb = _pick_block_batch(N, H, target_rows)
    steps = N // Nb

    # NCHW -> (N, H, W*Cin) with channels merged onto the lane axis.  No H pad
    # in HBM: conv1's padding=1 is handled in-kernel via the im2row zero rows.
    x_rows = jnp.transpose(x_nchw, (0, 2, 3, 1)).reshape(N, H, WCin)
    x_rows = x_rows.astype(compute_dtype)

    out_rows = pl.pallas_call(
        _conv2x_kernel,
        out_shape=jax.ShapeDtypeStruct((N, H, WCout), out_dtype),
        grid_spec=pltpu.PrefetchScalarGridSpec(
            num_scalar_prefetch=0,
            grid=(steps,),
            in_specs=[
                pl.BlockSpec((Nb, H, WCin), lambda n: (n, 0, 0)),
                # Constant index maps: weights/biases DMA'd once, stay resident.
                pl.BlockSpec((3 * WCin, WCmid), lambda n: (0, 0)),
                pl.BlockSpec((1, WCmid), lambda n: (0, 0)),
                pl.BlockSpec((3 * WCmid, WCout), lambda n: (0, 0)),
                pl.BlockSpec((1, WCout), lambda n: (0, 0)),
            ],
            out_specs=pl.BlockSpec((Nb, H, WCout), lambda n: (n, 0, 0)),
        ),
        compiler_params=pltpu.CompilerParams(
            dimension_semantics=("parallel",)),
    )(x_rows, w1s, b1t, w2s, b2t)

    # (N, H, W*Cout) -> (N, Cout, H, W)   (API boundary only; NHWC models skip it)
    return jnp.transpose(out_rows.reshape(N, H, W, Cout), (0, 3, 1, 2))


def _reference(x_nchw, w1_oihw, b1, w2_oihw, b2, compute_dtype=jnp.bfloat16):
    """Plain-JAX reference mirroring the kernel's bf16-operand / f32-accum math
    (eval-mode dropout).  Same rounding points as the kernel, so differences are
    accumulation-order only."""
    dn = ("NCHW", "OIHW", "NCHW")
    y = lax.conv_general_dilated(
        x_nchw.astype(compute_dtype), w1_oihw.astype(compute_dtype),
        (1, 1), ((1, 1), (1, 1)), dimension_numbers=dn,
        preferred_element_type=jnp.float32)
    y = y + b1[None, :, None, None]
    z = lax.conv_general_dilated(
        y.astype(compute_dtype), w2_oihw.astype(compute_dtype),
        (1, 1), ((1, 1), (1, 1)), dimension_numbers=dn,
        preferred_element_type=jnp.float32)
    z = z + b2[None, :, None, None]
    return jnp.maximum(z, 0.0)


if __name__ == "__main__":
    def run_case(N, Cin, Cout, H, W):
        Cmid = ceil(sqrt(Cin * Cout))  # = 6 for (4, 8)

        key = jax.random.PRNGKey(0)
        kx, kw1, kb1, kw2, kb2 = jax.random.split(key, 5)

        x = jax.random.normal(kx, (N, Cin, H, W), jnp.float32)
        # Deterministic synthetic parameters (PyTorch shapes: OIHW weights, (O,) bias)
        w1 = jax.random.normal(kw1, (Cmid, Cin, 3, 3), jnp.float32) * 0.2
        b1 = jax.random.normal(kb1, (Cmid,), jnp.float32) * 0.1
        w2 = jax.random.normal(kw2, (Cout, Cmid, 3, 3), jnp.float32) * 0.2
        b2 = jax.random.normal(kb2, (Cout,), jnp.float32) * 0.1

        params = prepare_params(w1, b1, w2, b2, W)       # hoisted one-time prep
        out = jax.block_until_ready(keep_size_conv2d_x2s(x, params))
        ref = _reference(x, w1, b1, w2, b2)

        assert out.shape == (N, Cout, H, W), out.shape
        # Tolerance sized for bf16 MXU operands with f32 accumulation; the
        # reference uses the same rounding points.
        np.testing.assert_allclose(np.asarray(out), np.asarray(ref),
                                   rtol=2e-2, atol=2e-2)

    # Spec-sized case (batch=2): Nb=1, grid=(2,) so both v7x cores get work.
    run_case(2, 4, 8, 16, 16)
    # Larger batch exercises the row-batching path: Nb=4, M=64 rows per dot.
    run_case(8, 4, 8, 16, 16)

    print("KERNEL_OK")
</pallas_src>

<mosaic_0001>
module attributes {stable_mosaic.version = 11 : i64} {
  func.func @_conv2x_kernel(%arg0: i32, %arg1: memref<1x16x64xbf16, #tpu.memory_space<vmem>>, %arg2: memref<192x96xbf16, #tpu.memory_space<vmem>>, %arg3: memref<1x96xf32, #tpu.memory_space<vmem>>, %arg4: memref<288x128xbf16, #tpu.memory_space<vmem>>, %arg5: memref<1x128xf32, #tpu.memory_space<vmem>>, %arg6: memref<1x16x128xf32, #tpu.memory_space<vmem>>) attributes {dimension_semantics = [#tpu.dimension_semantics<parallel>], iteration_bounds = array<i64: 2>, scalar_prefetch = 0 : i64, scratch_operands = 0 : i64, tpu.core_type = #tpu.core_type<tc>, window_params = [{transform_indices = @transform_0, window_bounds = array<i64: 1, 16, 64>}, {pipeline_mode = #tpu.pipeline_mode<synchronous>, transform_indices = @transform_1, window_bounds = array<i64: 192, 96>}, {pipeline_mode = #tpu.pipeline_mode<synchronous>, transform_indices = @transform_2, window_bounds = array<i64: 1, 96>}, {pipeline_mode = #tpu.pipeline_mode<synchronous>, transform_indices = @transform_3, window_bounds = array<i64: 288, 128>}, {pipeline_mode = #tpu.pipeline_mode<synchronous>, transform_indices = @transform_4, window_bounds = array<i64: 1, 128>}, {transform_indices = @transform_5, window_bounds = array<i64: 1, 16, 128>}]} {
    %c0 = arith.constant 0 : index
    %c0_0 = arith.constant 0 : index
    %c0_1 = arith.constant 0 : index
    %0 = vector.load %arg1[%c0, %c0_0, %c0_1] : memref<1x16x64xbf16, #tpu.memory_space<vmem>>, vector<1x16x64xbf16>
    %cst = arith.constant 0.000000e+00 : bf16
    %1 = vector.broadcast %cst : bf16 to vector<1x1x64xbf16>
    %2 = vector.extract_strided_slice %0 {offsets = [0, 0, 0], sizes = [1, 15, 64], strides = [1, 1, 1]} : vector<1x16x64xbf16> to vector<1x15x64xbf16>
    %3 = tpu.concatenate %1, %2 in 1 : vector<1x1x64xbf16>, vector<1x15x64xbf16> -> vector<1x16x64xbf16>
    %4 = vector.extract_strided_slice %0 {offsets = [0, 1, 0], sizes = [1, 15, 64], strides = [1, 1, 1]} : vector<1x16x64xbf16> to vector<1x15x64xbf16>
    %5 = tpu.concatenate %4, %1 in 1 : vector<1x15x64xbf16>, vector<1x1x64xbf16> -> vector<1x16x64xbf16>
    %6 = tpu.concatenate %3, %0, %5 in 2 : vector<1x16x64xbf16>, vector<1x16x64xbf16>, vector<1x16x64xbf16> -> vector<1x16x192xbf16>
    %7 = vector.shape_cast %6 : vector<1x16x192xbf16> to vector<16x192xbf16>
    %c0_2 = arith.constant 0 : index
    %c0_3 = arith.constant 0 : index
    %8 = vector.load %arg2[%c0_2, %c0_3] : memref<192x96xbf16, #tpu.memory_space<vmem>>, vector<192x96xbf16>
    %cst_4 = arith.constant dense<0.000000e+00> : vector<16x96xf32>
    %9 = tpu.matmul %7, %8, %cst_4 {dimension_numbers = #tpu.dot_dimension_numbers<[1], [0], [0], [1], [0, 0, 1, 1], [], []>} : vector<16x192xbf16>, vector<192x96xbf16>, vector<16x96xf32> -> vector<16x96xf32>
    %c0_5 = arith.constant 0 : index
    %c0_6 = arith.constant 0 : index
    %10 = vector.load %arg3[%c0_5, %c0_6] : memref<1x96xf32, #tpu.memory_space<vmem>>, vector<1x96xf32>
    %11 = vector.broadcast %10 : vector<1x96xf32> to vector<16x96xf32>
    %12 = arith.addf %9, %11 : vector<16x96xf32>
    %13 = arith.truncf %12 : vector<16x96xf32> to vector<16x96xbf16>
    %14 = vector.shape_cast %13 : vector<16x96xbf16> to vector<1x16x96xbf16>
    %cst_7 = arith.constant 0.000000e+00 : bf16
    %15 = vector.broadcast %cst_7 : bf16 to vector<1x1x96xbf16>
    %16 = vector.extract_strided_slice %14 {offsets = [0, 0, 0], sizes = [1, 15, 96], strides = [1, 1, 1]} : vector<1x16x96xbf16> to vector<1x15x96xbf16>
    %17 = tpu.concatenate %15, %16 in 1 : vector<1x1x96xbf16>, vector<1x15x96xbf16> -> vector<1x16x96xbf16>
    %18 = vector.extract_strided_slice %14 {offsets = [0, 1, 0], sizes = [1, 15, 96], strides = [1, 1, 1]} : vector<1x16x96xbf16> to vector<1x15x96xbf16>
    %19 = tpu.concatenate %18, %15 in 1 : vector<1x15x96xbf16>, vector<1x1x96xbf16> -> vector<1x16x96xbf16>
    %20 = tpu.concatenate %17, %14, %19 in 2 : vector<1x16x96xbf16>, vector<1x16x96xbf16>, vector<1x16x96xbf16> -> vector<1x16x288xbf16>
    %21 = vector.shape_cast %20 : vector<1x16x288xbf16> to vector<16x288xbf16>
    %c0_8 = arith.constant 0 : index
    %c0_9 = arith.constant 0 : index
    %22 = vector.load %arg4[%c0_8, %c0_9] : memref<288x128xbf16, #tpu.memory_space<vmem>>, vector<288x128xbf16>
    %cst_10 = arith.constant dense<0.000000e+00> : vector<16x128xf32>
    %23 = tpu.matmul %21, %22, %cst_10 {dimension_numbers = #tpu.dot_dimension_numbers<[1], [0], [0], [1], [0, 0, 1, 1], [], []>} : vector<16x288xbf16>, vector<288x128xbf16>, vector<16x128xf32> -> vector<16x128xf32>
    %c0_11 = arith.constant 0 : index
    %c0_12 = arith.constant 0 : index
    %24 = vector.load %arg5[%c0_11, %c0_12] : memref<1x128xf32, #tpu.memory_space<vmem>>, vector<1x128xf32>
    %25 = vector.broadcast %24 : vector<1x128xf32> to vector<16x128xf32>
    %26 = arith.addf %23, %25 : vector<16x128xf32>
    %cst_13 = arith.constant 0.000000e+00 : f32
    %27 = vector.broadcast %cst_13 : f32 to vector<16x128xf32>
    %28 = arith.maximumf %26, %27 : vector<16x128xf32>
    %29 = vector.shape_cast %28 : vector<16x128xf32> to vector<1x16x128xf32>
    %c0_14 = arith.constant 0 : index
    %c0_15 = arith.constant 0 : index
    %c0_16 = arith.constant 0 : index
    %30 = vector.load %arg6[%c0_14, %c0_15, %c0_16] : memref<1x16x128xf32, #tpu.memory_space<vmem>>, vector<1x16x128xf32>
    tpu.vector_store %arg6[%c0_14, %c0_15, %c0_16], %29 {strides = array<i32>} : memref<1x16x128xf32, #tpu.memory_space<vmem>>, vector<1x16x128xf32>,
    return
  }
  func.func @transform_0(%arg0: i32) -> (i32, i32, i32) {
    %c0_i32 = arith.constant 0 : i32
    %c0_i32_0 = arith.constant 0 : i32
    %c0_i32_1 = arith.constant 0 : i32
    return %arg0, %c0_i32, %c0_i32_0 : i32, i32, i32
  }
  func.func @transform_1(%arg0: i32) -> (i32, i32) {
    %c0_i32 = arith.constant 0 : i32
    %c0_i32_0 = arith.constant 0 : i32
    %c0_i32_1 = arith.constant 0 : i32
    return %c0_i32, %c0_i32_0 : i32, i32
  }
  func.func @transform_2(%arg0: i32) -> (i32, i32) {
    %c0_i32 = arith.constant 0 : i32
    %c0_i32_0 = arith.constant 0 : i32
    %c0_i32_1 = arith.constant 0 : i32
    return %c0_i32, %c0_i32_0 : i32, i32
  }
  func.func @transform_3(%arg0: i32) -> (i32, i32) {
    %c0_i32 = arith.constant 0 : i32
    %c0_i32_0 = arith.constant 0 : i32
    %c0_i32_1 = arith.constant 0 : i32
    return %c0_i32, %c0_i32_0 : i32, i32
  }
  func.func @transform_4(%arg0: i32) -> (i32, i32) {
    %c0_i32 = arith.constant 0 : i32
    %c0_i32_0 = arith.constant 0 : i32
    %c0_i32_1 = arith.constant 0 : i32
    return %c0_i32, %c0_i32_0 : i32, i32
  }
  func.func @transform_5(%arg0: i32) -> (i32, i32, i32) {
    %c0_i32 = arith.constant 0 : i32
    %c0_i32_0 = arith.constant 0 : i32
    %c0_i32_1 = arith.constant 0 : i32
    return %arg0, %c0_i32, %c0_i32_0 : i32, i32, i32
  }
}

</mosaic_0001>

<bundles_post_ra>
// kernel: tpu_custom_call.1
= control target key start
LH: loop header
LB: loop body
LE: loop exit
PB: predicated region body
PF: predicated region fallthrough
CT: control target
= control target key end

     0   :  { %10 = vsyncpa [#allocation3], 0  ;;  %s1440_s0 = inlined_call_operand.hbm [shape: bf16[2,16,64], index: 0, kind: input, shape index: {}]   ;;  %s1441_s1 = inlined_call_operand.hbm [shape: bf16[192,96], index: 1, kind: input, shape index: {}]   ;;  %s1442_s2 = inlined_call_operand.vmem [shape: f32[1,96], index: 2, kind: input, shape index: {}]   ;;  %s1443_s3 = inlined_call_operand.hbm [shape: bf16[288,128], index: 3, kind: input, shape index: {}]   ;;  %s1444_s4 = inlined_call_operand.vmem [shape: f32[1,128], index: 4, kind: input, shape index: {}]   ;;  %s1445_s5 = inlined_call_operand.hbm [shape: f32[2,16,128], index: 5, kind: output, shape index: {}]  }
   0x1   :  { %12 = vsyncpa [#allocation3 + $0x1], 0 }
   0x2   :  { %13 = vsyncpa [#allocation6], 0 }
   0x3   :  { %14 = vsyncpa [#allocation4], 0 }
   0x4   :  { %16 = vsyncpa [#allocation4 + $0x1], 0  ;;  %s1215_s18 = smov 0   ;;  %s1217_s19 = smov 0  }
   0x5   :  { %s1219_s20 = smov 0   ;;  %s1221_s21 = smov 0  }
   0x6 LB: > { %s1236_s22 = sadd.s32 4294967295, %s1170_s21   ;;  %s827_s23 = sadd.s32 4294967294, %s1170_s21   ;;  %s1170_s21 = sphi %s1221_s21, %s1472_s21   ;;  %s1166_s20 = sphi %s1219_s20, %s1471_s20   ;;  %s1162_s19 = sphi %s1217_s19, %s1470_s19   ;;  %s1158_s18 = sphi %s1215_s18, %s1469_s18  }
   0x7   : > { %p42_p0 = scmp.ne.s32.totalorder %s1162_s19, %s1158_s18  ;;  %p1446_p1 = scmp.eq.s32.totalorder %s1236_s22, 0 }
   0x8   : > { %p150_p2 = scmp.eq.s32.totalorder %s1236_s22, 1  ;;  %p156_p3 = scmp.eq.s32.totalorder %s827_s23, 1 }
   0x9   : > { %p1245_p4 = por %p1446_p1, %p42_p0  ;;  %p828_p5 = scmp.ge.s32.totalorder %s1170_s21, 1 }
   0xa   : > { %p1250_p6 = por %p156_p3, %p42_p0  ;;  %p163_p7 = scmp.lt.s32.totalorder %s1170_s21, 3 }
   0xb   : > { %s1451_s24 = scalar_select %p1245_p4, 1, 0 }
   0xc   : > { %s1452_s25 = scalar_select %p1250_p6, 1, 0 }
   0xd   : > { %p1255_p8 = pnand %p828_p5, %p163_p7  ;;  %s1172_s27 = smov [#allocation5]  }
   0xe   : > { %s175_s28 = sshll.u32 %s1172_s27, 4  ;;  %s1173_s30 = smov [#allocation7]   ;;  %s176_s28 = int_to_ptr.vmem [resolvable:$true] %s175_s28 }
   0xf   : > { %s1453_s26 = scalar_select %p1255_p8, 1, 0 }
  0x10   : > { %p927_p9 = pneg %p1255_p8  ;;  %s191_s6 = sshll.u32 %s1173_s30, 4  ;;  %s192_s6 = int_to_ptr.vmem [resolvable:$true] %s191_s6 }
  0x11   : > { %s1033_s7 = scalar_lea.vmem %s176_s28, 1536  ;;  %p1041_p5 = scmp.lt.s32.totalorder %s176_s28, %s176_s28 }
  0x12   : > { %p1264_p11 = pnand %p927_p9, %p1446_p1  ;;  %p1034_p13 = scmp.ne.s32.totalorder %s176_s28, %s1033_s7 }
  0x13   : > { %p1042_p7 = scmp.lt.s32.totalorder %s1033_s7, %s1033_s7 }
  0x14   : > { %p1024_p12 = pneg %p1264_p11 }
  0x15   : > { %p1043_p10 = por %p1042_p7, %p1041_p5 }
  0x16   : > { %p1036_p0 = pnand %p1034_p13, %p1024_p12 }
  0x18   : > { %p1037_p3 = pneg %p1036_p0 }
  0x1a   : > { %p1044_p9 = pnand %p1043_p10, %p1037_p3 }
  0x1c   : > { %1047 = shalt.err (!%p1044_p9)
}
  0x1d   : > { %s1447_s8 = smov 64   ;;  %s1175_s9 = smov 4  }
  0x1e   : > { %930 = dma.hbm_to_vmem [thread:$0]  (!%p1264_p11), %s1441_s1, 1536, %s176_s28, [#allocation6], %s1447_s8, %s1447_s8, %s1175_s9  }
  0x1f   : > { %s1059_s12 = scalar_lea.vmem %s192_s6, 2304  ;;  %p1067_p10 = scmp.lt.s32.totalorder %s192_s6, %s192_s6 }
  0x20   : > { %p1060_p13 = scmp.ne.s32.totalorder %s192_s6, %s1059_s12  ;;  %p1068_p3 = scmp.lt.s32.totalorder %s1059_s12, %s1059_s12 }
  0x22   : > { %p1062_p0 = pnand %p1060_p13, %p1024_p12  ;;  %p1069_p7 = por %p1068_p3, %p1067_p10 }
  0x24   : > { %p1063_p5 = pneg %p1062_p0 }
  0x26   : > { %p1070_p9 = pnand %p1069_p7, %p1063_p5 }
  0x28   : > { %1073 = shalt.err (!%p1070_p9)
}
  0x29   : > { %933 = dma.hbm_to_vmem [thread:$0]  (!%p1264_p11), %s1443_s3, 2304, %s192_s6, [#allocation6], %s1447_s8, %s1447_s8, %s1175_s9  }
  0x2a   : > { %s1293_s15 = sadd.s32 1, %s1170_s21   ;;  %s29_s16 = sadd.s32 1, %s1166_s20 }
  0x2b   : > { %s26_s17 = ssub.s32 %s1170_s21, %s1293_s15  ;;  %p36_p12 = scmp.ne.s32.totalorder %s1166_s20, %s1162_s19 }
  0x2c   : > { %p27_p13 = scmp.eq.s32.totalorder %s26_s17, 0  ;;  %p37_p0 = scmp.eq.s32.totalorder %s1170_s21, 0 }
  0x2d   : > { %p1303_p5 = por %p150_p2, %p36_p12  ;;  %p944_p10 = scmp.lt.s32.totalorder %s1170_s21, 2 }
  0x2e   : > { %s1309_s27 = scalar_select %p27_p13, %s1166_s20, %s29_s16  }
  0x2f   : > { %s1455_s23 = scalar_select %p1303_p5, 1, 0 }
  0x30   : > { %p38_p3 = por %p37_p0, %p36_p12  ;;  %s208_s28 = sand.u32 1, %s1166_s20  }
  0x31   : > { %s832_s29 = sshll.u32 %s208_s28, 3  ;;  %s880_s30 = sshll.u32 %s1170_s21, 7 }
  0x32   : > { %s1316_s10 = scalar_lea.hbm %s1440_s0, %s880_s30  ;;  %s212_s11 = scalar_lea.vmem [#allocation2], %s832_s29 }
  0x33   : > { %s219_s12 = sshll.u32 %s212_s11, 4  ;;  %p1320_p2 = pnand %p944_p10, %p38_p3  ;;  %s1318_s12 = int_to_ptr.vmem [resolvable:$true] %s219_s12 }
  0x34   : > { %s1324_s14 = scalar_lea.sflag [#allocation3], %s208_s28  ;;  %s1074_s16 = scalar_lea.hbm %s1316_s10, 128 }
  0x35   : > { %p1075_p11 = scmp.ne.s32.totalorder %s1316_s10, %s1074_s16  ;;  %p1076_p7 = pneg %p1320_p2 }
  0x36   : > { %s1079_s29 = scalar_lea.hbm %s1440_s0, 256  ;;  %p1080_p13 = scmp.lt.s32.totalorder %s1316_s10, %s1440_s0 }
  0x37   : > { %p1077_p9 = pnand %p1076_p7, %p1075_p11  ;;  %p1081_p0 = scmp.lt.s32.totalorder %s1079_s29, %s1074_s16 }
  0x39   : > { %p1078_p12 = pneg %p1077_p9  ;;  %p1082_p10 = por %p1081_p0, %p1080_p13 }
  0x3b   : > { %p1083_p3 = pnand %p1082_p10, %p1078_p12 }
  0x3d   : > { %1086 = shalt.err (!%p1083_p3)
}
  0x3e   : > { %s1087_s28 = scalar_lea.vmem %s1318_s12, 128  ;;  %s1176_s11 = smov [#allocation2]  }
  0x3f   : > { %p1088_p1 = scmp.ne.s32.totalorder %s1318_s12, %s1087_s28  ;;  %s1092_s8 = sshll.u32 %s1176_s11, 4  ;;  %s1093_s8 = int_to_ptr.vmem [resolvable:$false] %s1092_s8 }
  0x40   : > { %s1094_s17 = scalar_lea.vmem %s1093_s8, 256  ;;  %p1095_p9 = scmp.lt.s32.totalorder %s1318_s12, %s1093_s8 }
  0x41   : > { %p1090_p6 = pnand %p1088_p1, %p1076_p7  ;;  %p1096_p5 = scmp.lt.s32.totalorder %s1094_s17, %s1087_s28 }
  0x43   : > { %p1091_p11 = pneg %p1090_p6  ;;  %p1097_p4 = por %p1096_p5, %p1095_p9 }
  0x45   : > { %p1098_p8 = pnand %p1097_p4, %p1091_p11 }
  0x47   : > { %1101 = shalt.err (!%p1098_p8)
}
  0x48   : > { %s1457_s16 = smov 64   ;;  %p1458_p1 = scmp.ne.s32.totalorder %s1453_s26, 0 }
  0x49   : > { %937 = dma.hbm_to_vmem [thread:$0]  (!%p1320_p2), %s1316_s10, 128, %s1318_s12, %s1324_s14, %s1457_s16, %s1457_s16, %s1175_s9  }
  0x4a   : > { %231 = sbr.rel (%p1458_p1) target bundleno = 748 (0x2ec), region = 40  ;;  %s1351_s30 = sand.u32 (!%p1458_p1), 1, %s1162_s19  }
  0x4b   : > { %s836_s8 = sshll.u32 (!%p1458_p1), %s1351_s30, 3  ;;  %s234_s29 = scalar_lea.sflag (!%p1458_p1), [#allocation3], %s1351_s30 }
  0x4c   : > { %s237_s6 = scalar_lea.vmem (!%p1458_p1), [#allocation2], %s836_s8  ;;  %p1459_p4 = scmp.ne.s32.totalorder (!%p1458_p1), %s1451_s24, 0 }
  0x4f   : > { %1145 = dma.done.wait (%p1459_p4), %s234_s29, 128  }
  0x50   : > { %1147 = vsyncadd (%p1459_p4), %s234_s29, 4294967168  ;;  %p1460_p6 = scmp.eq.s32.totalorder %s1236_s22, 0 }
  0x52   : > { %1149 = dma.done.wait (%p1460_p6), [#allocation6], 3840   ;;  %p1461_p8 = pmov %p1460_p6 }
  0x53   : > { %v1177_v0 = vmov 0   ;;  %vm296_vm0 = vsmask.f32 7424  ;;  %v991_v1 = vld [vmem:[%s237_s6] sm:$0xff]   ;;  %s1178_s26 = smov 64   ;;  %vm295_vm1 = vcmask 1047552  }
  0x54   : > { %1151 = vsyncadd (%p1461_p8), [#allocation6], 4294963456  ;;  %412 = vmatprep.subr.bf16.mxu0 %v1177_v0  ;;  %v992_v2 = vld [vmem:[#allocation5 + $0x38] sm:$0xff]   ;;  %299 = vrot.lane.b32.xlu0 %v991_v1, %s1178_s26  ;;  %v281_v3 = vshrl.u32 %v991_v1, 16  ;;  %v993_v4 = vld [vmem:[#allocation5 + $0x30] sm:$0xff]   ;;  %v284_v5 = vshll.u32 %v991_v1, 16 }
  0x55   : > { %413 = vmatpush1.bf16.msra.mxu0 %v992_v2  ;;  %vm1364_vm2 = vmand %vm295_vm1, %vm296_vm0  ;;  %v994_v10 = vld [vmem:[#allocation5 + $0x28] sm:$0xff]   ;;  %vm301_vm3 = vcmask 523264   ;;  %v995_v13 = vld [vmem:[#allocation5 + $0x20] sm:$0xff]   ;;  %vm288_vm4 = vcmask 1040384   ;;  %vm289_vm5 = vsmask.f32 256 }
  0x56   : > { %414 = vmatprep.subr.bf16.mxu0 %v1177_v0  ;;  %v283_v6 = vrot.slane %v281_v3, 7  ;;  %v292_v7 = vrot.slane %v284_v5, 1  ;;  %v996_v14 = vld [vmem:[#allocation5 + $0x18] sm:$0xff]   ;;  %v997_v15 = vld [vmem:[#allocation5 + $0x10] sm:$0xff]   ;;  %v998_v16 = vld [vmem:[#allocation5 + $0x8] sm:$0xff]   ;;  %v1179_v48 = vmov 0.0  }
  0x57   : > { %v999_v17 = vld [vmem:[#allocation5] sm:$0xff]   ;;  %v1000_v18 = vld [vmem:[#allocation5 + $0x58] sm:$0xff]   ;;  %v1001_v19 = vld [vmem:[#allocation5 + $0x50] sm:$0xff]   ;;  %s1180_s10 = smov 96   ;;  %vm473_vm7 = vcmask 785408   ;;  %vm1181_vm8 = vmmov 0  }
  0x58   : > { %v286_v9 = vor.u32 %v284_v5, %v283_v6  ;;  %v293_v11 = vor.u32 %v292_v7, %v281_v3  ;;  %v1002_v20 = vld [vmem:[#allocation5 + $0x48] sm:$0xff]   ;;  %v1003_v21 = vld [vmem:[#allocation5 + $0x40] sm:$0xff]   ;;  %vm1371_vm6 = vmand %vm288_vm4, %vm289_vm5  ;;  %vm632_vm9 = vcmask 261120   ;;  %s839_s14 = sshll.u32 %s1351_s30, 4  ;;  %s881_s11 = sshll.u32 %s1236_s22, 8 }
  0x59   : > { %415 = vmatpush1.bf16.msra.mxu0 %v993_v4  ;;  %v1004_v26 = vld [vmem:[#allocation7 + $0x78] sm:$0xff]   ;;  %v1006_v28 = vld [vmem:[#allocation7 + $0x70] sm:$0xff]   ;;  %v1008_v30 = vld [vmem:[#allocation7 + $0x68] sm:$0xff]   ;;  %s271_s7 = scalar_lea.vmem [#allocation8], %s839_s14  ;;  %s1397_s8 = scalar_lea.hbm %s1445_s5, %s881_s11 }
  0x5a   : > { %416 = vmatprep.subr.bf16.mxu0 %v1177_v0  ;;  %v298_v12 = vsel %vm1364_vm2, %v293_v11, 0  ;;  %v291_v23 = vsel %vm1371_vm6, 0, %v286_v9  ;;  %v1005_v27 = vld [vmem:[#allocation7 + $0x38] sm:$0xff]   ;;  %882 = vmatprep.subr.bf16.mxu1 %v1004_v26  ;;  %v1007_v29 = vld [vmem:[#allocation7 + $0x30] sm:$0xff]   ;;  %v1009_v31 = vld [vmem:[#allocation7 + $0x28] sm:$0xff]   ;;  %s735_s28 = sshll.u32 %s271_s7, 4  ;;  %s1392_s28 = int_to_ptr.vmem [resolvable:$true] %s735_s28 }
  0x5b   : > { %854 = vmatprep.mubr.msk.bf16.mxu0 %vm301_vm3, %v298_v12  ;;  %883 = vmatpush3.bf16.msra.mxu1 %v1005_v27  ;;  %v1010_v32 = vld [vmem:[#allocation7 + $0x60] sm:$0xff]   ;;  %v1012_v34 = vld [vmem:[#allocation7 + $0x58] sm:$0xff]   ;;  %v1014_v36 = vld [vmem:[#allocation7 + $0x50] sm:$0xff]   ;;  %s722_s29 = scalar_lea.sflag [#allocation4], %s1351_s30  ;;  %s1102_s6 = scalar_lea.vmem %s1392_s28, 256 }
  0x5c   : > { %884 = vmatprep.subr.bf16.mxu1 %v1006_v28  ;;  %v1011_v33 = vld [vmem:[#allocation7 + $0x20] sm:$0xff]   ;;  %v1013_v35 = vld [vmem:[#allocation7 + $0x18] sm:$0xff]   ;;  %v1015_v37 = vld [vmem:[#allocation7 + $0x10] sm:$0xff]   ;;  %p1103_p5 = scmp.ne.s32.totalorder %s1392_s28, %s1102_s6  ;;  %p1466_p2 = scmp.ne.s32.totalorder %s1455_s23, 0 }
  0x5d   : > { %417 = vmatpush1.bf16.msra.mxu0 %v994_v10  ;;  %v1016_v38 = vld [vmem:[#allocation7 + $0x48] sm:$0xff]   ;;  %v1018_v40 = vld [vmem:[#allocation7 + $0x40] sm:$0xff]   ;;  %v841_v43 = vld [vmem:[%s1442_s2] ss:$0 sm:$0xff]  ;;  %s1182_s22 = smov [#allocation8]  }
  0x5e   : > { %418 = vmatprep.subr.bf16.mxu0 %v1177_v0  ;;  %v1017_v39 = vld [vmem:[#allocation7 + $0x8] sm:$0xff]   ;;  %v1019_v41 = vld [vmem:[#allocation7] sm:$0xff]   ;;  %v855_v5 = vld [vmem:[%s1444_s4] ss:$0 sm:$0xff]  ;;  %p1104_p7 = pnand %p1103_p5, %p1466_p2 }
  0x5f   : > { %885 = vmatpush3.bf16.msra.mxu1 %v1007_v29  ;;  %v1020_v60 = vld [vmem:[#allocation7 + $0x88] sm:$0xff]  }
  0x60   : > { %886 = vmatprep.subr.bf16.mxu1 %v1008_v30  ;;  %p1105_p12 = pneg %p1104_p7 }
  0x61   : > { %419 = vmatpush1.bf16.msra.mxu0 %v995_v13 }
  0x62   : > { %420 = vmatprep.subr.bf16.mxu0 %v1177_v0 }
  0x63   : > { %887 = vmatpush3.bf16.msra.mxu1 %v1009_v31 }
  0x64   : > { %888 = vmatprep.subr.bf16.mxu1 %v1010_v32 }
  0x65   : > { %421 = vmatpush1.bf16.msra.mxu0 %v996_v14 }
  0x66   : > { %422 = vmatprep.subr.bf16.mxu0 %v1177_v0 }
  0x67   : > { %889 = vmatpush3.bf16.msra.mxu1 %v1011_v33 }
  0x68   : > { %890 = vmatprep.subr.bf16.mxu1 %v1012_v34 }
  0x69   : > { %423 = vmatpush1.bf16.msra.mxu0 %v997_v15 }
  0x6a   : > { %424 = vmatprep.subr.bf16.mxu0 %v1177_v0 }
  0x6b   : > { %891 = vmatpush3.bf16.msra.mxu1 %v1013_v35 }
  0x6c   : > { %892 = vmatprep.subr.bf16.mxu1 %v1014_v36 }
  0x6d   : > { %425 = vmatpush1.bf16.msra.mxu0 %v998_v16 }
  0x6e   : > { %426 = vmatprep.subr.bf16.mxu0 %v1177_v0 }
  0x6f   : > { %893 = vmatpush3.bf16.msra.mxu1 %v1015_v37 }
  0x70   : > { %894 = vmatprep.subr.bf16.mxu1 %v1016_v38 }
  0x71   : > { %427 = vmatpush1.bf16.msra.mxu0 %v999_v17 }
  0x72   : > { %436 = vmatprep.subr.bf16.mxu0 %v1177_v0 }
  0x73   : > { %895 = vmatpush3.bf16.msra.mxu1 %v1017_v39 }
  0x74   : > { %896 = vmatprep.subr.bf16.mxu1 %v1018_v40 }
  0x75   : > { %437 = vmatpush2.bf16.msra.mxu0 %v1000_v18 }
  0x76   : > { %438 = vmatprep.subr.bf16.mxu0 %v1177_v0 }
  0x77   : > { %897 = vmatpush3.bf16.msra.mxu1 %v1019_v41 }
  0x78   : > { %907 = vmatprep.subr.bf16.mxu1 %v1179_v48 }
  0x79   : > { %439 = vmatpush2.bf16.msra.mxu0 %v1001_v19 }
  0x7a   : > { %440 = vmatprep.subr.bf16.mxu0 %v1177_v0 }
  0x7d   : > { %441 = vmatpush2.bf16.msra.mxu0 %v1002_v20 }
  0x7e   : > { %442 = vmatprep.subr.bf16.mxu0 %v1177_v0  ;;  %v1021_v0 = vld [vmem:[#allocation7 + $0x80] sm:$0xff]  }
  0x81   : > { %443 = vmatpush2.bf16.msra.mxu0 %v1003_v21 }
  0xc6   : > { %v300_v24 = vpop.permute.xlu0 %299 }
  0xc7   : > { %v304_v25 = vsel %vm301_vm3, %v291_v23, %v300_v24 }
  0xc8   : > { %445 = vmatmul.mubr.bf16.vlgmr.msra.gmra.mxu0 %v304_v25 }
 0x188   : > { %v446_v42 = vpop.f32.mrf.mxu0 }
 0x189   : > { %v447_v46 = vadd.f32 %v841_v43, %v446_v42 }
 0x18a   : > { %v448_v44 = vpop.f32.mrf.mxu0 }
 0x18c   : > { %v449_v45 = vpop.f32.mrf.mxu0 }
 0x18d   : > { %v450_v47 = vadd.f32 %v841_v43, %v449_v45 }
 0x18e   : > { %v451_v49 = vpop.f32.mrf.mxu0 }
 0x18f   : > { %v453_v50 = vpack.c.bf16 %v450_v47, %v447_v46 }
 0x191   : > { %468 = vrot.lane.b32.xlu0 %v453_v50, %s1180_s10  ;;  %v455_v51 = vshrl.u32 %v453_v50, 16  ;;  %v458_v52 = vshll.u32 %v453_v50, 16 }
 0x193   : > { %v463_v53 = vrot.slane %v458_v52, 1  ;;  %v457_v54 = vrot.slane %v455_v51, 7 }
 0x195   : > { %v464_v55 = vor.u32 %v463_v53, %v455_v51  ;;  %v460_v56 = vor.u32 %v458_v52, %v457_v54 }
 0x197   : > { %v466_v57 = vsel %vm1364_vm2, %v464_v55, 0  ;;  %v462_v62 = vsel %vm1371_vm6, 0, %v460_v56 }
 0x198   : > { %471 = vrot.lane.b32.xlu1 %v466_v57, %s1178_s26  ;;  %s1106_s26 = sshll.u32 %s1182_s22, 4  ;;  %s1107_s26 = int_to_ptr.vmem [resolvable:$false] %s1106_s26 }
 0x199   : > { %s1108_s24 = scalar_lea.vmem %s1107_s26, 512  ;;  %p1109_p13 = scmp.lt.s32.totalorder %s1392_s28, %s1107_s26 }
 0x19a   : > { %p1110_p0 = scmp.lt.s32.totalorder %s1108_s24, %s1102_s6 }
 0x19c   : > { %p1111_p10 = por %p1110_p0, %p1109_p13 }
 0x19e   : > { %p1112_p3 = pnand %p1111_p10, %p1105_p12 }
 0x203   : > { %v469_v58 = vpop.permute.xlu0 %468 }
 0x204   : > { %v476_v63 = vsel %vm473_vm7, %v462_v62, %v469_v58 }
 0x20a   : > { %v472_v59 = vpop.permute.xlu1 %471 }
 0x20b   : > { %v479_v61 = vsel %vm301_vm3, %v469_v58, %v472_v59 }
 0x20c   : > { %667 = vmatprep.mubr.bf16.mxu1 %v479_v61 }
 0x20d   : > { %668 = vmatmul.mubr.bf16.vlgmr.msra.gmra.mxu1 %v476_v63 }
 0x20e   : > { %908 = vmatpush3.bf16.msra.mxu1 %v1020_v60  ;;  %911 = vmatprep.mubr.msk.bf16.mxu1 %vm1181_vm8, %v1179_v48 }
 0x20f   : > { %909 = vmatprep.subr.bf16.mxu1 %v1179_v48 }
 0x212   : > { %910 = vmatpush3.bf16.msra.mxu1 %v1021_v0 }
 0x215   : > { %912 = vmatmul.mubr.msk.bf16.vlgmr.msra.gmra.mxu1 %vm632_vm9, %v472_v59 }
 0x2cd   : > { %v898_v1 = vpop.f32.mrf.mxu1 }
 0x2cf   : > { %v899_v2 = vpop.f32.mrf.mxu1 }
 0x2d0   : > { %v900_v3 = vadd.f32 %v899_v2, %v898_v1 }
 0x2d1   : > { %v901_v4 = vpop.f32.mrf.mxu1 }
 0x2d2   : > { %v670_v8 = vadd.f32 %v900_v3, %v855_v5 }
 0x2d3   : > { %v902_v6 = vpop.f32.mrf.mxu1 }
 0x2d4   : > { %v903_v7 = vadd.f32 %v902_v6, %v901_v4 }
 0x2d5   : > { %v710_v9 = vpop.f32.mrf.mxu1 }
 0x2d6   : > { %v711_v10 = vadd.f32 %v710_v9, %v670_v8  ;;  %v673_v13 = vadd.f32 %v903_v7, %v855_v5 }
 0x2d7   : > { %v913_v11 = vpop.f32.mrf.mxu1 }
 0x2d8   : > { %v717_v12 = vmax.f32 %v711_v10, 0.0 }
 0x2d9   : > { %v713_v14 = vpop.f32.mrf.mxu1 }
 0x2da   : > { %719 = vst [vmem:[%s271_s7] sm:$0xff] %v717_v12  ;;  %v714_v15 = vadd.f32 %v713_v14, %v673_v13 }
 0x2db   : > { %v914_v16 = vpop.f32.mrf.mxu1 }
 0x2dc   : > { %v718_v17 = vmax.f32 %v714_v15, 0.0 }
 0x2de   : > { %720 = vst [vmem:[%s271_s7 + $0x8] sm:$0xff] %v718_v17 }
 0x2df   : > { %1115 = shalt.err (!%p1112_p3)
}
 0x2e0   : > { %s1116_s9 = scalar_lea.hbm %s1397_s8, 256  ;;  %s1120_s13 = scalar_lea.hbm %s1445_s5, 512 }
 0x2e1   : > { %p1117_p11 = scmp.ne.s32.totalorder %s1397_s8, %s1116_s9  ;;  %p1121_p4 = scmp.lt.s32.totalorder %s1397_s8, %s1445_s5 }
 0x2e2   : > { %p1122_p6 = scmp.lt.s32.totalorder %s1120_s13, %s1116_s9 }
 0x2e3   : > { %p1118_p9 = pnand %p1117_p11, %p1466_p2 }
 0x2e4   : > { %p1123_p8 = por %p1122_p6, %p1121_p4 }
 0x2e5   : > { %p1119_p1 = pneg %p1118_p9 }
 0x2e7   : > { %p1124_p5 = pnand %p1123_p8, %p1119_p1 }
 0x2e9   : > { %1127 = shalt.err (!%p1124_p5)
}
 0x2ea   : > { %s1183_s11 = smov 128   ;;  %s1184_s17 = smov 8  }
 0x2eb   : > { %925 = dma.vmem_to_hbm [thread:$0]  (%p1466_p2), %s1392_s28, 256, %s1397_s8, %s722_s29, %s1183_s11, %s1183_s11, %s1184_s17  }
 0x2ec PF: > { %s750_s16 = sand.u32 1, %s1158_s18   ;;  %p1467_p7 = scmp.ne.s32.totalorder %s1452_s25, 0 }
 0x2ed   : > { %p1468_p12 = scmp.ge.s32.totalorder %s1170_s21, 2  ;;  %s751_s6 = scalar_lea.sflag [#allocation4], %s750_s16 }
 0x2ef   : > { %p939_p13 = pnand %p1468_p12, %p1467_p7 }
 0x2f1   : > { %p940_p0 = pneg %p939_p13 }
 0x2f3   : > { %1153 = dma.done.wait (%p940_p0), %s751_s6, 256  }
 0x2f4   : > { %1155 = vsyncadd (%p940_p0), %s751_s6, 4294967040  ;;  %p19_p10 = scmp.ge.s32.totalorder %s1293_s15, 4   ;;  %s1469_s18 = smov %s1162_s19 }
 0x2f5   : > { %s1470_s19 = smov %s1166_s20  ;;  %s1471_s20 = smov %s1309_s27 }
 0x2f6   : > { %s1472_s21 = smov %s1293_s15  ;;  %21 = sbr.rel (!%p19_p10) target bundleno = 6 (0x6), region = 93 }
 0x2fb   :  { %756 = vsyncpa [#allocation3], 1 }
 0x2fc   :  { %758 = vsyncpa [#allocation3 + $0x1], 1 }
 0x2fd   :  { %759 = vsyncpa [#allocation6], 1 }
 0x2fe   :  { %760 = vsyncpa [#allocation4], 1 }
 0x2ff   :  { %762 = vsyncpa [#allocation4 + $0x1], 1 }

</bundles_post_ra>
